<compile_context>
chip_gen: v6e
topology: v6e:2x2x1
jax: 0.10.0
libtpu: 0.0.40
codegen_flags: <defaults>
</compile_context>

<pallas_src>
import functools

import jax
import jax.numpy as jnp
from jax.experimental import pallas as pl
from jax.experimental.pallas import tpu as pltpu

LANE = 128  # lane-dense padding for the final (tiny) output dimension


def _discriminator_kernel(x_ref, w1_ref, b1_ref, w2_ref, b2_ref,
                          w3_ref, b3_ref, o_ref):
    # x_ref: (TB, C) bf16;  w*: bf16;  b*: f32;  o_ref: (TB, OUT_PAD) f32
    x = x_ref[...]
    # Layer 1: Linear(C -> 2C) + ReLU   (bf16 MXU, f32 accumulate)
    h1 = jnp.dot(x, w1_ref[...], preferred_element_type=jnp.float32)
    h1 = jnp.maximum(h1 + b1_ref[...], 0.0)
    # Layer 2: Linear(2C -> H) + ReLU
    h2 = jnp.dot(h1.astype(jnp.bfloat16), w2_ref[...],
                 preferred_element_type=jnp.float32)
    h2 = jnp.maximum(h2 + b2_ref[...], 0.0)
    # Layer 3: Linear(H -> OUT_PAD) logits (lane-dense padded output)
    out = jnp.dot(h2.astype(jnp.bfloat16), w3_ref[...],
                  preferred_element_type=jnp.float32)
    o_ref[...] = (out + b3_ref[...]).astype(o_ref.dtype)


def discriminator_forward(x, params, lambda_term, *, out_channels=2, tb=128):
    """x: (B, in_channels); lambda_term unused in forward (GRL is identity)."""
    del lambda_term  # identity in forward; only affects backward of the GRL
    w1, b1, w2, b2, w3, b3 = params
    B, C = x.shape
    H1 = w1.shape[1]          # 2C
    H = w2.shape[1]           # hidden
    OUT_PAD = w3.shape[1]     # lane-dense padded output width (128)

    # ---- batch tiling ---------------------------------------------------
    if B <= tb:
        # Single tile covering the whole (possibly odd-sized) batch; block ==
        # full array dims, so the (8,128) rule is satisfied by equality.
        TB, Bp = B, B
        xp = x
    else:
        TB = tb                                    # multiple of 8 by choice
        Bp = pl.cdiv(B, TB) * TB
        xp = jnp.pad(x, ((0, Bp - B), (0, 0)))
    grid = (Bp // TB,)

    # bf16 activations into the kernel (halves x DMA; matmuls accumulate f32).
    xb = xp.astype(jnp.bfloat16)

    # ---- specs: x/out tiled over batch, weights resident across tiles ----
    def resident(a):  # constant index_map -> DMA'd once, stays in VMEM
        return pl.BlockSpec(a.shape, lambda i: tuple(0 for _ in a.shape))

    x_spec = pl.BlockSpec((TB, C), lambda i: (i, 0))
    out_spec = pl.BlockSpec((TB, OUT_PAD), lambda i: (i, 0))

    # ---- advisory cost estimate for the XLA scheduler ---------------------
    flops = 2 * Bp * (C * H1 + H1 * H + H * OUT_PAD)
    bytes_accessed = (xb.size * 2                       # bf16 input
                      + (w1.size + w2.size + w3.size) * 2   # bf16 weights
                      + (b1.size + b2.size + b3.size) * 4   # f32 biases
                      + Bp * OUT_PAD * 4)                   # f32 output
    cost = pl.CostEstimate(flops=flops, transcendentals=0,
                           bytes_accessed=bytes_accessed)

    out = pl.pallas_call(
        _discriminator_kernel,
        out_shape=jax.ShapeDtypeStruct((Bp, OUT_PAD), jnp.float32),
        grid_spec=pltpu.PrefetchScalarGridSpec(
            num_scalar_prefetch=0,
            grid=grid,
            in_specs=[x_spec,
                      resident(w1), resident(b1),
                      resident(w2), resident(b2),
                      resident(w3), resident(b3)],
            out_specs=out_spec,
        ),
        compiler_params=pltpu.CompilerParams(
            dimension_semantics=("parallel",)),   # megacore on v7x
        cost_estimate=cost,
    )(xb, w1, b1, w2, b2, w3, b3)

    # Strip batch padding and the lane padding of the tiny final layer.
    return out[:B, :out_channels]


def init_discriminator_params(key, in_channels, hidden, out_channels,
                              out_pad=LANE):
    """Matches PyTorch __initialize_weights: Linear weights ~ N(0, 0.1), bias=0.

    Weights stored transposed (in_features, out_features) in bf16; biases f32.
    The final layer is zero-padded to `out_pad` lanes for lane-dense stores.
    """
    k1, k2, k3 = jax.random.split(key, 3)
    w1 = (0.1 * jax.random.normal(k1, (in_channels, 2 * in_channels),
                                  jnp.float32)).astype(jnp.bfloat16)
    b1 = jnp.zeros((1, 2 * in_channels), jnp.float32)
    w2 = (0.1 * jax.random.normal(k2, (2 * in_channels, hidden),
                                  jnp.float32)).astype(jnp.bfloat16)
    b2 = jnp.zeros((1, hidden), jnp.float32)
    w3_core = 0.1 * jax.random.normal(k3, (hidden, out_channels), jnp.float32)
    w3 = jnp.zeros((hidden, out_pad), jnp.float32).at[:, :out_channels].set(
        w3_core).astype(jnp.bfloat16)
    b3 = jnp.zeros((1, out_pad), jnp.float32)
    return (w1, b1, w2, b2, w3, b3)


def _reference_forward(x, params, out_channels):
    """Pure-JAX reference of the same bf16-matmul / f32-accumulate math."""
    w1, b1, w2, b2, w3, b3 = params
    xb = x.astype(jnp.bfloat16)
    h1 = jnp.maximum(
        jnp.dot(xb, w1, preferred_element_type=jnp.float32) + b1, 0.0)
    h2 = jnp.maximum(
        jnp.dot(h1.astype(jnp.bfloat16), w2,
                preferred_element_type=jnp.float32) + b2, 0.0)
    out = jnp.dot(h2.astype(jnp.bfloat16), w3,
                  preferred_element_type=jnp.float32) + b3
    return out[:, :out_channels]


if __name__ == "__main__":
    # Small shapes consistent with the module (in_channels=1024 scaled down).
    IN_CHANNELS, HIDDEN, OUT_CHANNELS = 32, 32, 2
    key = jax.random.PRNGKey(0)
    kx1, kx2, kp = jax.random.split(key, 3)
    params = init_discriminator_params(kp, IN_CHANNELS, HIDDEN, OUT_CHANNELS)
    lambda_term = 0.5  # unused in forward (GRL is identity)

    # Case 1: single-tile path (B <= TB).
    B1 = 8
    x1 = jax.random.normal(kx1, (B1, IN_CHANNELS), jnp.float32)
    out1 = jax.block_until_ready(
        discriminator_forward(x1, params, lambda_term,
                              out_channels=OUT_CHANNELS))
    ref1 = _reference_forward(x1, params, OUT_CHANNELS)
    assert out1.shape == (B1, OUT_CHANNELS)
    assert jnp.allclose(out1, ref1, atol=1e-3, rtol=1e-3)

    # Case 2: batch-tiled path (grid over batch, with batch padding).
    B2, TB = 20, 8
    x2 = jax.random.normal(kx2, (B2, IN_CHANNELS), jnp.float32)
    out2 = jax.block_until_ready(
        discriminator_forward(x2, params, lambda_term,
                              out_channels=OUT_CHANNELS, tb=TB))
    ref2 = _reference_forward(x2, params, OUT_CHANNELS)
    assert out2.shape == (B2, OUT_CHANNELS)
    assert jnp.allclose(out2, ref2, atol=1e-3, rtol=1e-3)

    # TODO(synk): Gradient_Reverse_Layer backward (grad negation * lambda) is a
    # custom-VJP concern outside this forward kernel.
    print("KERNEL_OK")
</pallas_src>

<mosaic_0001>
module attributes {stable_mosaic.version = 11 : i64} {
  func.func @_discriminator_kernel(%arg0: i32, %arg1: memref<8x32xbf16, #tpu.memory_space<vmem>>, %arg2: memref<32x64xbf16, #tpu.memory_space<vmem>>, %arg3: memref<1x64xf32, #tpu.memory_space<vmem>>, %arg4: memref<64x32xbf16, #tpu.memory_space<vmem>>, %arg5: memref<1x32xf32, #tpu.memory_space<vmem>>, %arg6: memref<32x128xbf16, #tpu.memory_space<vmem>>, %arg7: memref<1x128xf32, #tpu.memory_space<vmem>>, %arg8: memref<8x128xf32, #tpu.memory_space<vmem>>) attributes {dimension_semantics = [#tpu.dimension_semantics<parallel>], iteration_bounds = array<i64: 1>, scalar_prefetch = 0 : i64, scratch_operands = 0 : i64, tpu.core_type = #tpu.core_type<tc>, window_params = [{transform_indices = @transform_0, window_bounds = array<i64: 8, 32>}, {pipeline_mode = #tpu.pipeline_mode<synchronous>, transform_indices = @transform_1, window_bounds = array<i64: 32, 64>}, {pipeline_mode = #tpu.pipeline_mode<synchronous>, transform_indices = @transform_2, window_bounds = array<i64: 1, 64>}, {pipeline_mode = #tpu.pipeline_mode<synchronous>, transform_indices = @transform_3, window_bounds = array<i64: 64, 32>}, {pipeline_mode = #tpu.pipeline_mode<synchronous>, transform_indices = @transform_4, window_bounds = array<i64: 1, 32>}, {pipeline_mode = #tpu.pipeline_mode<synchronous>, transform_indices = @transform_5, window_bounds = array<i64: 32, 128>}, {pipeline_mode = #tpu.pipeline_mode<synchronous>, transform_indices = @transform_6, window_bounds = array<i64: 1, 128>}, {transform_indices = @transform_7, window_bounds = array<i64: 8, 128>}]} {
    %c0 = arith.constant 0 : index
    %c0_0 = arith.constant 0 : index
    %0 = vector.load %arg1[%c0, %c0_0] : memref<8x32xbf16, #tpu.memory_space<vmem>>, vector<8x32xbf16>
    %c0_1 = arith.constant 0 : index
    %c0_2 = arith.constant 0 : index
    %1 = vector.load %arg2[%c0_1, %c0_2] : memref<32x64xbf16, #tpu.memory_space<vmem>>, vector<32x64xbf16>
    %cst = arith.constant dense<0.000000e+00> : vector<8x64xf32>
    %2 = tpu.matmul %0, %1, %cst {dimension_numbers = #tpu.dot_dimension_numbers<[1], [0], [0], [1], [0, 0, 1, 1], [], []>} : vector<8x32xbf16>, vector<32x64xbf16>, vector<8x64xf32> -> vector<8x64xf32>
    %c0_3 = arith.constant 0 : index
    %c0_4 = arith.constant 0 : index
    %3 = vector.load %arg3[%c0_3, %c0_4] : memref<1x64xf32, #tpu.memory_space<vmem>>, vector<1x64xf32>
    %4 = vector.broadcast %3 : vector<1x64xf32> to vector<8x64xf32>
    %5 = arith.addf %2, %4 : vector<8x64xf32>
    %cst_5 = arith.constant 0.000000e+00 : f32
    %6 = vector.broadcast %cst_5 : f32 to vector<8x64xf32>
    %7 = arith.maximumf %5, %6 : vector<8x64xf32>
    %8 = arith.truncf %7 : vector<8x64xf32> to vector<8x64xbf16>
    %c0_6 = arith.constant 0 : index
    %c0_7 = arith.constant 0 : index
    %9 = vector.load %arg4[%c0_6, %c0_7] : memref<64x32xbf16, #tpu.memory_space<vmem>>, vector<64x32xbf16>
    %cst_8 = arith.constant dense<0.000000e+00> : vector<8x32xf32>
    %10 = tpu.matmul %8, %9, %cst_8 {dimension_numbers = #tpu.dot_dimension_numbers<[1], [0], [0], [1], [0, 0, 1, 1], [], []>} : vector<8x64xbf16>, vector<64x32xbf16>, vector<8x32xf32> -> vector<8x32xf32>
    %c0_9 = arith.constant 0 : index
    %c0_10 = arith.constant 0 : index
    %11 = vector.load %arg5[%c0_9, %c0_10] : memref<1x32xf32, #tpu.memory_space<vmem>>, vector<1x32xf32>
    %12 = vector.broadcast %11 : vector<1x32xf32> to vector<8x32xf32>
    %13 = arith.addf %10, %12 : vector<8x32xf32>
    %cst_11 = arith.constant 0.000000e+00 : f32
    %14 = vector.broadcast %cst_11 : f32 to vector<8x32xf32>
    %15 = arith.maximumf %13, %14 : vector<8x32xf32>
    %16 = arith.truncf %15 : vector<8x32xf32> to vector<8x32xbf16>
    %c0_12 = arith.constant 0 : index
    %c0_13 = arith.constant 0 : index
    %17 = vector.load %arg6[%c0_12, %c0_13] : memref<32x128xbf16, #tpu.memory_space<vmem>>, vector<32x128xbf16>
    %cst_14 = arith.constant dense<0.000000e+00> : vector<8x128xf32>
    %18 = tpu.matmul %16, %17, %cst_14 {dimension_numbers = #tpu.dot_dimension_numbers<[1], [0], [0], [1], [0, 0, 1, 1], [], []>} : vector<8x32xbf16>, vector<32x128xbf16>, vector<8x128xf32> -> vector<8x128xf32>
    %c0_15 = arith.constant 0 : index
    %c0_16 = arith.constant 0 : index
    %19 = vector.load %arg7[%c0_15, %c0_16] : memref<1x128xf32, #tpu.memory_space<vmem>>, vector<1x128xf32>
    %20 = vector.broadcast %19 : vector<1x128xf32> to vector<8x128xf32>
    %21 = arith.addf %18, %20 : vector<8x128xf32>
    %c0_17 = arith.constant 0 : index
    %c0_18 = arith.constant 0 : index
    %22 = vector.load %arg8[%c0_17, %c0_18] : memref<8x128xf32, #tpu.memory_space<vmem>>, vector<8x128xf32>
    tpu.vector_store %arg8[%c0_17, %c0_18], %21 {strides = array<i32>} : memref<8x128xf32, #tpu.memory_space<vmem>>, vector<8x128xf32>,
    return
  }
  func.func @transform_0(%arg0: i32) -> (i32, i32) {
    %c0_i32 = arith.constant 0 : i32
    %c0_i32_0 = arith.constant 0 : i32
    return %arg0, %c0_i32 : i32, i32
  }
  func.func @transform_1(%arg0: i32) -> (i32, i32) {
    %c0_i32 = arith.constant 0 : i32
    %c0_i32_0 = arith.constant 0 : i32
    %c0_i32_1 = arith.constant 0 : i32
    return %c0_i32, %c0_i32_0 : i32, i32
  }
  func.func @transform_2(%arg0: i32) -> (i32, i32) {
    %c0_i32 = arith.constant 0 : i32
    %c0_i32_0 = arith.constant 0 : i32
    %c0_i32_1 = arith.constant 0 : i32
    return %c0_i32, %c0_i32_0 : i32, i32
  }
  func.func @transform_3(%arg0: i32) -> (i32, i32) {
    %c0_i32 = arith.constant 0 : i32
    %c0_i32_0 = arith.constant 0 : i32
    %c0_i32_1 = arith.constant 0 : i32
    return %c0_i32, %c0_i32_0 : i32, i32
  }
  func.func @transform_4(%arg0: i32) -> (i32, i32) {
    %c0_i32 = arith.constant 0 : i32
    %c0_i32_0 = arith.constant 0 : i32
    %c0_i32_1 = arith.constant 0 : i32
    return %c0_i32, %c0_i32_0 : i32, i32
  }
  func.func @transform_5(%arg0: i32) -> (i32, i32) {
    %c0_i32 = arith.constant 0 : i32
    %c0_i32_0 = arith.constant 0 : i32
    %c0_i32_1 = arith.constant 0 : i32
    return %c0_i32, %c0_i32_0 : i32, i32
  }
  func.func @transform_6(%arg0: i32) -> (i32, i32) {
    %c0_i32 = arith.constant 0 : i32
    %c0_i32_0 = arith.constant 0 : i32
    %c0_i32_1 = arith.constant 0 : i32
    return %c0_i32, %c0_i32_0 : i32, i32
  }
  func.func @transform_7(%arg0: i32) -> (i32, i32) {
    %c0_i32 = arith.constant 0 : i32
    %c0_i32_0 = arith.constant 0 : i32
    return %arg0, %c0_i32 : i32, i32
  }
}

</mosaic_0001>

<bundles_post_ra>
// kernel: tpu_custom_call.1
= control target key start
LH: loop header
LB: loop body
LE: loop exit
PB: predicated region body
PF: predicated region fallthrough
CT: control target
= control target key end

     0   :  { %v350_v1 = vmov 0.0   ;;  %vm351_vm0 = vmmov 0   ;;  %vm52_vm1 = vcmask 261120   ;;  %s437_s0 = inlined_call_operand.vmem [shape: bf16[8,32], index: 0, kind: input, shape index: {}]   ;;  %s438_s1 = inlined_call_operand.vmem [shape: bf16[32,64], index: 1, kind: input, shape index: {}]   ;;  %s439_s2 = inlined_call_operand.vmem [shape: f32[1,64], index: 2, kind: input, shape index: {}]   ;;  %s440_s3 = inlined_call_operand.vmem [shape: bf16[64,32], index: 3, kind: input, shape index: {}]   ;;  %s441_s4 = inlined_call_operand.vmem [shape: f32[1,32], index: 4, kind: input, shape index: {}]   ;;  %s442_s5 = inlined_call_operand.vmem [shape: bf16[32,128], index: 5, kind: input, shape index: {}]   ;;  %s443_s6 = inlined_call_operand.vmem [shape: f32[1,128], index: 6, kind: input, shape index: {}]   ;;  %s444_s7 = inlined_call_operand.hbm [shape: f32[8,128], index: 7, kind: output, shape index: {}]  }
   0x1   :  { %v320_v0 = vld [vmem:[%s438_s1 + $0x8] sm:$0xff]   ;;  %289 = vmatprep.subr.bf16.mxu0 %v350_v1  ;;  %297 = vmatprep.subr.bf16.mxu1 %v350_v1  ;;  %v321_v2 = vld [vmem:[%s438_s1] sm:$0xff]   ;;  %v322_v3 = vld [vmem:[%s440_s3 + $0x18] sm:$0xff]  }
   0x2   :  { %290 = vmatpush3.bf16.msra.mxu0 %v320_v0  ;;  %293 = vmatprep.mubr.msk.bf16.mxu0 %vm351_vm0, %v350_v1  ;;  %v28_v4 = vld [vmem:[%s437_s0] sm:$0xf]  ;;  %v323_v5 = vld [vmem:[%s440_s3 + $0x10] sm:$0xff]  }
   0x3   :  { %291 = vmatprep.subr.bf16.mxu0 %v350_v1  ;;  %305 = vmatprep.mubr.msk.bf16.mxu1 %vm351_vm0, %v350_v1 }
   0x4   :  { %298 = vmatpush3.bf16.msra.mxu1 %v322_v3 }
   0x5   :  { %299 = vmatprep.subr.bf16.mxu1 %v350_v1 }
   0x6   :  { %292 = vmatpush3.bf16.msra.mxu0 %v321_v2 }
   0x7   :  { %309 = vmatprep.subr.bf16.mxu0 %v350_v1 }
   0x8   :  { %12 = vsyncpa [#allocation3], 0  ;;  %300 = vmatpush3.bf16.msra.mxu1 %v323_v5  ;;  %v324_v6 = vld [vmem:[%s440_s3 + $0x8] sm:$0xff]   ;;  %v325_v7 = vld [vmem:[%s440_s3] sm:$0xff]   ;;  %vm137_vm2 = vcmask 523264   ;;  %s352_s21 = smov [#allocation2]  }
   0x9   :  { %294 = vmatmul.mubr.msk.bf16.vlgmr.msra.gmra.mxu0 %vm52_vm1, %v28_v4  ;;  %301 = vmatprep.subr.bf16.mxu1 %v350_v1  ;;  %v326_v8 = vld [vmem:[%s442_s5 + $0x8] sm:$0xff]   ;;  %v264_v9 = vld [vmem:[%s439_s2] ss:$0 sm:$0xff] }
   0xa   :  { %313 = vmatprep.mubr.msk.bf16.mxu0 %vm351_vm0, %v350_v1  ;;  %310 = vmatpush3.bf16.msra.mxu0 %v326_v8  ;;  %v327_v17 = vld [vmem:[%s442_s5] sm:$0xff]   ;;  %s256_s5 = sshll.u32 %s352_s21, 4  ;;  %s257_s5 = int_to_ptr.vmem [resolvable:$true] %s256_s5 }
   0xb   :  { %311 = vmatprep.subr.bf16.mxu0 %v350_v1  ;;  %v268_v18 = vld [vmem:[%s441_s4] ss:$0 sm:$0xff]  ;;  %s328_s4 = scalar_lea.vmem %s257_s5, 128  ;;  %p333_p1 = scmp.lt.s32.totalorder %s257_s5, %s257_s5 }
   0xc   :  { %302 = vmatpush3.bf16.msra.mxu1 %v324_v6  ;;  %v274_v26 = vld [vmem:[%s443_s6] ss:$0 sm:$0xff]  ;;  %p329_p0 = scmp.ne.s32.totalorder %s257_s5, %s328_s4  ;;  %p334_p2 = scmp.lt.s32.totalorder %s328_s4, %s328_s4 }
   0xd   :  { %303 = vmatprep.subr.bf16.mxu1 %v350_v1 }
   0xe   :  { %312 = vmatpush3.bf16.msra.mxu0 %v327_v17  ;;  %p335_p3 = por %p334_p2, %p333_p1 }
  0x10   :  { %304 = vmatpush3.bf16.msra.mxu1 %v325_v7  ;;  %p336_p4 = pnand %p335_p3, %p329_p0 }
  0xc9   :  { %v90_v10 = vpop.f32.mrf.mxu0 }
  0xca   :  { %v91_v11 = vadd.f32 %v264_v9, %v90_v10 }
  0xcb   :  { %v295_v12 = vpop.f32.mrf.mxu0 }
  0xcc   :  { %v96_v13 = vmax.f32 %v91_v11, 0.0 }
  0xcd   :  { %v93_v14 = vpop.f32.mrf.mxu0 }
  0xce   :  { %v97_v15 = vpack.c.bf16 %v96_v13, %v96_v13 }
  0xcf   :  { %v296_v16 = vpop.f32.mrf.mxu0 }
  0xd0   :  { %306 = vmatmul.mubr.msk.bf16.vlgmr.msra.gmra.mxu1 %vm137_vm2, %v97_v15 }
 0x190   :  { %v175_v19 = vpop.f32.mrf.mxu1 }
 0x191   :  { %v176_v20 = vadd.f32 %v268_v18, %v175_v19 }
 0x192   :  { %v307_v21 = vpop.f32.mrf.mxu1 }
 0x193   :  { %v181_v22 = vmax.f32 %v176_v20, 0.0 }
 0x194   :  { %v178_v23 = vpop.f32.mrf.mxu1 }
 0x195   :  { %v182_v24 = vpack.c.bf16 %v181_v22, %v181_v22 }
 0x196   :  { %v308_v25 = vpop.f32.mrf.mxu1 }
 0x197   :  { %314 = vmatmul.mubr.msk.bf16.vlgmr.msra.gmra.mxu0 %vm52_vm1, %v182_v24 }
 0x257   :  { %v243_v27 = vpop.f32.mrf.mxu0 }
 0x258   :  { %v244_v28 = vadd.f32 %v274_v26, %v243_v27 }
 0x259   :  { %v315_v29 = vpop.f32.mrf.mxu0 }
 0x25a   :  { %249 = vst [vmem:[#allocation2] sm:$0xff] %v244_v28 }
 0x25b   :  { %v246_v30 = vpop.f32.mrf.mxu0 }
 0x25c   :  { %339 = shalt.err (!%p336_p4)
}
 0x25d   :  { %259 = dma.vmem_to_hbm [thread:$0]  %s257_s5, 128, %s444_s7, [#allocation3]   ;;  %v316_v31 = vpop.f32.mrf.mxu0 }
 0x25e   :  { %348 = dma.done.wait [#allocation3], 128  }
 0x25f   :  { %349 = vsyncadd [#allocation3], 4294967168 }
 0x260   :  { %263 = vsyncpa [#allocation3], 1 }

</bundles_post_ra>
